<compile_context>
chip_gen: v7x
topology: tpu7x:2x2x1
jax: 0.10.0
libtpu: 0.0.40
codegen_flags: <defaults>
</compile_context>

<pallas_src>
import functools

import jax
import jax.numpy as jnp
from jax import lax
from jax.experimental import pallas as pl
from jax.experimental.pallas import tpu as pltpu


def _conv3x3_kernel(x_ref, w_ref, b_ref, o_ref, stage_ref, rhs_ref, *, H, W, NB):
    # x_ref    : (NB, Cin, H*W)      bf16, unpadded flattened images
    # w_ref    : (Cout, 9*Cin)       bf16, K ordered (kh, kw, ci)
    # b_ref    : (Cout, 1)           f32 bias
    # o_ref    : (NB, Cout, H*W)     output (x dtype), lane-dense
    # stage_ref: (NB, Cin, L)        bf16 zero-bordered flat staging, L = H*W + 2*W + 2
    # rhs_ref  : (9*Cin, NB*H*W)     bf16 packed im2col RHS
    HW = H * W
    Cin = x_ref.shape[1]
    D0 = W + 1                  # data offset inside the zero-bordered stage
    L = HW + 2 * W + 2          # stage flat length

    # Lane masks for the horizontally clipped taps (kw=0 reads col w-1, kw=2
    # reads col w+1).  Hoisted out of the tap loop; VPU selects are free filler.
    col = lax.broadcasted_iota(jnp.int32, (Cin, HW), 1) % W
    not_first_col = col != 0
    not_last_col = col != (W - 1)
    zeros_slab = jnp.zeros((Cin, HW), dtype=rhs_ref.dtype)

    # Fused padding: zero borders + one contiguous interior copy per image.
    # Borders are rewritten every step (megacore-safe; scratch is never assumed
    # zero-initialized).
    for nb in range(NB):
        stage_ref[nb, :, 0:D0] = jnp.zeros((Cin, D0), dtype=stage_ref.dtype)
        stage_ref[nb, :, D0 + HW:L] = jnp.zeros((Cin, L - D0 - HW),
                                                dtype=stage_ref.dtype)
        stage_ref[nb, :, D0:D0 + HW] = x_ref[nb]

    # im2col pack: 9 taps x NB images -> (9*Cin, NB*HW).  Each tap is one
    # contiguous lane-offset slice of the stage ref (realignment handled in the
    # load path), with a lane mask for the column-clipped taps.
    for kh in range(3):
        for kw in range(3):
            t = kh * 3 + kw
            off = kh * W + kw
            for nb in range(NB):
                slab = stage_ref[nb, :, off:off + HW]
                if kw == 0:
                    slab = jnp.where(not_first_col, slab, zeros_slab)
                elif kw == 2:
                    slab = jnp.where(not_last_col, slab, zeros_slab)
                rhs_ref[t * Cin:(t + 1) * Cin, nb * HW:(nb + 1) * HW] = slab

    # Single deep MXU contraction (K = 9*Cin), f32 accumulation, f32 bias add.
    acc = jnp.dot(w_ref[...], rhs_ref[...], preferred_element_type=jnp.float32)
    acc = acc + b_ref[...]                              # (Cout, 1) lane-broadcast
    for nb in range(NB):                                # aligned lane slices (nb*HW)
        o_ref[nb] = acc[:, nb * HW:(nb + 1) * HW].astype(o_ref.dtype)


def conv3x3_pallas(x_nchw, weight, bias, *, compute_dtype=jnp.bfloat16,
                   vmem_budget_bytes=32 * 1024 * 1024):
    """nn.Conv2d(Cin, Cout, kernel_size=3, padding=1, bias=True) forward.

    x_nchw: (N, Cin, H, W); weight: (Cout, Cin, 3, 3); bias: (Cout,).
    """
    N, Cin, H, W = x_nchw.shape
    Cout = weight.shape[0]
    HW = H * W
    L = HW + 2 * W + 2

    # bf16 at the pallas_call boundary (halves input DMA + in-kernel im2col
    # stores); accumulation stays f32.
    # TODO(synk): in a real pipeline the producer should already emit bf16 so
    # this convert fuses away instead of being a standalone XLA op.
    x_flat = x_nchw.reshape(N, Cin, HW).astype(compute_dtype)
    w2 = jnp.transpose(weight, (0, 2, 3, 1)).reshape(Cout, 9 * Cin).astype(compute_dtype)
    b2 = bias.reshape(Cout, 1).astype(jnp.float32)

    cbytes = jnp.dtype(compute_dtype).itemsize
    obytes = jnp.dtype(x_nchw.dtype).itemsize

    # VMEM per image: double-buffered in/out blocks + (single-buffered) scratch.
    per_image = (2 * Cin * HW * cbytes          # input block (pipeline x2)
                 + 2 * Cout * HW * obytes       # output block (pipeline x2)
                 + Cin * L * cbytes             # staging scratch
                 + 9 * Cin * HW * cbytes)       # im2col scratch
    fixed = 2 * (Cout * 9 * Cin * cbytes + Cout * 4)   # weights + bias blocks

    # Images per grid step: maximize the lane stream per matmul, but keep >= 2
    # grid steps when N >= 2 (v7x: 2 TensorCores) and stay under the VMEM budget.
    nb = 1
    for cand in range(1, N + 1):
        if N % cand:
            continue
        if N >= 2 and (N // cand) < 2:
            continue
        if cand * per_image + fixed > vmem_budget_bytes:
            continue
        nb = cand
    steps = N // nb

    kernel = functools.partial(_conv3x3_kernel, H=H, W=W, NB=nb)

    vmem_need = nb * per_image + fixed
    flops = 2 * N * Cout * 9 * Cin * H * W
    bytes_accessed = (x_flat.size * cbytes + w2.size * cbytes + b2.size * 4
                      + N * Cout * HW * obytes)

    out_flat = pl.pallas_call(
        kernel,
        out_shape=jax.ShapeDtypeStruct((N, Cout, HW), x_nchw.dtype),
        grid_spec=pltpu.PrefetchScalarGridSpec(
            num_scalar_prefetch=0,
            grid=(steps,),
            in_specs=[
                pl.BlockSpec((nb, Cin, HW), lambda n: (n, 0, 0)),
                pl.BlockSpec((Cout, 9 * Cin), lambda n: (0, 0)),   # revisited block
                pl.BlockSpec((Cout, 1), lambda n: (0, 0)),         # revisited block
            ],
            out_specs=pl.BlockSpec((nb, Cout, HW), lambda n: (n, 0, 0)),
            scratch_shapes=[
                pltpu.VMEM((nb, Cin, L), compute_dtype),       # staging
                pltpu.VMEM((9 * Cin, nb * HW), compute_dtype),  # im2col RHS
            ],
        ),
        compiler_params=pltpu.CompilerParams(
            dimension_semantics=("parallel",),
            vmem_limit_bytes=int(min(max(2 * vmem_need, 8 << 20), 48 << 20)),
        ),
        cost_estimate=pl.CostEstimate(flops=flops, transcendentals=0,
                                      bytes_accessed=bytes_accessed),
    )(x_flat, w2, b2)

    # Already NCHW and junk-free; reshape of contiguous trailing dims is free.
    return out_flat.reshape(N, Cout, H, W)


if __name__ == "__main__":
    key = jax.random.PRNGKey(0)
    k_x, k_w, k_b = jax.random.split(key, 3)

    # Module defaults: in_channels = out_channels = 16, kernel 3x3, padding 1.
    N, Cin, Cout, H, W = 2, 16, 16, 16, 16
    x = jax.random.normal(k_x, (N, Cin, H, W), dtype=jnp.float32)
    weight = jax.random.normal(k_w, (Cout, Cin, 3, 3), dtype=jnp.float32) * 0.05
    bias = jax.random.normal(k_b, (Cout,), dtype=jnp.float32) * 0.05

    out = conv3x3_pallas(x, weight, bias)
    out = jax.block_until_ready(out)

    # Reference: XLA conv (same semantics as nn.Conv2d(3,3,pad=1,bias=True)).
    ref = lax.conv_general_dilated(
        x, weight, window_strides=(1, 1), padding=((1, 1), (1, 1)),
        dimension_numbers=("NCHW", "OIHW", "NCHW")) + bias[None, :, None, None]
    assert out.shape == (N, Cout, H, W)
    # bf16 inputs/weights with f32 accumulation: loosened tolerance.
    assert jnp.allclose(out, ref, atol=5e-2, rtol=5e-2), float(
        jnp.max(jnp.abs(out - ref)))

    print("KERNEL_OK")
</pallas_src>

<mosaic_0001>
module attributes {stable_mosaic.version = 11 : i64} {
  func.func @_conv3x3_kernel(%arg0: i32, %arg1: memref<1x16x256xbf16, #tpu.memory_space<vmem>>, %arg2: memref<16x144xbf16, #tpu.memory_space<vmem>>, %arg3: memref<16x1xf32, #tpu.memory_space<vmem>>, %arg4: memref<1x16x256xf32, #tpu.memory_space<vmem>>, %arg5: memref<1x16x290xbf16, #tpu.memory_space<vmem>>, %arg6: memref<144x256xbf16, #tpu.memory_space<vmem>>) attributes {dimension_semantics = [#tpu.dimension_semantics<parallel>], iteration_bounds = array<i64: 2>, scalar_prefetch = 0 : i64, scratch_operands = 2 : i64, tpu.core_type = #tpu.core_type<tc>, window_params = [{transform_indices = @transform_0, window_bounds = array<i64: 1, 16, 256>}, {pipeline_mode = #tpu.pipeline_mode<synchronous>, transform_indices = @transform_1, window_bounds = array<i64: 16, 144>}, {pipeline_mode = #tpu.pipeline_mode<synchronous>, transform_indices = @transform_2, window_bounds = array<i64: 16, 1>}, {transform_indices = @transform_3, window_bounds = array<i64: 1, 16, 256>}]} {
    %0 = tpu.iota {dimensions = array<i32: 1>} : vector<16x256xi32>
    %c16_i32 = arith.constant 16 : i32
    %c0_i32 = arith.constant 0 : i32
    %1 = arith.cmpi eq, %c16_i32, %c0_i32 : i32
    %c1_i32 = arith.constant 1 : i32
    %2 = arith.select %1, %c1_i32, %c16_i32 : i32
    %3 = vector.broadcast %2 : i32 to vector<16x256xi32>
    %4 = arith.remsi %0, %3 : vector<16x256xi32>
    %c0_i32_0 = arith.constant 0 : i32
    %5 = vector.broadcast %c0_i32_0 : i32 to vector<16x256xi32>
    %6 = arith.cmpi ne, %4, %5 : vector<16x256xi32>
    %c0_i32_1 = arith.constant 0 : i32
    %7 = vector.broadcast %c0_i32_1 : i32 to vector<16x256xi32>
    %8 = arith.cmpi slt, %4, %7 : vector<16x256xi32>
    %c0_i32_2 = arith.constant 0 : i32
    %9 = arith.cmpi slt, %2, %c0_i32_2 : i32
    %10 = vector.broadcast %9 : i1 to vector<16x256xi1>
    %11 = vector.broadcast %10 : vector<16x256xi1> to vector<16x256xi1>
    %12 = arith.xori %8, %11 : vector<16x256xi1>
    %13 = arith.andi %12, %6 : vector<16x256xi1>
    %14 = vector.broadcast %2 : i32 to vector<16x256xi32>
    %15 = arith.addi %4, %14 : vector<16x256xi32>
    %16 = arith.select %13, %15, %4 : vector<16x256xi1>, vector<16x256xi32>
    %c0_i32_3 = arith.constant 0 : i32
    %17 = vector.broadcast %c0_i32_3 : i32 to vector<16x256xi32>
    %18 = arith.cmpi ne, %16, %17 : vector<16x256xi32>
    %c15_i32 = arith.constant 15 : i32
    %19 = vector.broadcast %c15_i32 : i32 to vector<16x256xi32>
    %20 = arith.cmpi ne, %16, %19 : vector<16x256xi32>
    %cst = arith.constant 0.000000e+00 : bf16
    %21 = vector.broadcast %cst : bf16 to vector<16x256xbf16>
    %cst_4 = arith.constant 0.000000e+00 : bf16
    %22 = vector.broadcast %cst_4 : bf16 to vector<16x17xbf16>
    %c0 = arith.constant 0 : index
    %c0_5 = arith.constant 0 : index
    %c0_6 = arith.constant 0 : index
    %23 = vector.load %arg5[%c0, %c0_5, %c0_6] : memref<1x16x290xbf16, #tpu.memory_space<vmem>>, vector<1x16x17xbf16>
    %24 = vector.shape_cast %23 : vector<1x16x17xbf16> to vector<16x17xbf16>
    %25 = vector.shape_cast %22 : vector<16x17xbf16> to vector<1x16x17xbf16>
    tpu.vector_store %arg5[%c0, %c0_5, %c0_6], %25 {strides = array<i32>} : memref<1x16x290xbf16, #tpu.memory_space<vmem>>, vector<1x16x17xbf16>,
    %cst_7 = arith.constant 0.000000e+00 : bf16
    %26 = vector.broadcast %cst_7 : bf16 to vector<16x17xbf16>
    %c0_8 = arith.constant 0 : index
    %c0_9 = arith.constant 0 : index
    %c273 = arith.constant 273 : index
    %27 = vector.load %arg5[%c0_8, %c0_9, %c273] : memref<1x16x290xbf16, #tpu.memory_space<vmem>>, vector<1x16x17xbf16>
    %28 = vector.shape_cast %27 : vector<1x16x17xbf16> to vector<16x17xbf16>
    %29 = vector.shape_cast %26 : vector<16x17xbf16> to vector<1x16x17xbf16>
    tpu.vector_store %arg5[%c0_8, %c0_9, %c273], %29 {strides = array<i32>} : memref<1x16x290xbf16, #tpu.memory_space<vmem>>, vector<1x16x17xbf16>,
    %c0_10 = arith.constant 0 : index
    %c0_11 = arith.constant 0 : index
    %c0_12 = arith.constant 0 : index
    %30 = vector.load %arg1[%c0_10, %c0_11, %c0_12] : memref<1x16x256xbf16, #tpu.memory_space<vmem>>, vector<1x16x256xbf16>
    %31 = vector.shape_cast %30 : vector<1x16x256xbf16> to vector<16x256xbf16>
    %c0_13 = arith.constant 0 : index
    %c0_14 = arith.constant 0 : index
    %c17 = arith.constant 17 : index
    %32 = vector.load %arg5[%c0_13, %c0_14, %c17] : memref<1x16x290xbf16, #tpu.memory_space<vmem>>, vector<1x16x256xbf16>
    %33 = vector.shape_cast %32 : vector<1x16x256xbf16> to vector<16x256xbf16>
    %34 = vector.shape_cast %31 : vector<16x256xbf16> to vector<1x16x256xbf16>
    tpu.vector_store %arg5[%c0_13, %c0_14, %c17], %34 {strides = array<i32>} : memref<1x16x290xbf16, #tpu.memory_space<vmem>>, vector<1x16x256xbf16>,
    %c0_15 = arith.constant 0 : index
    %c0_16 = arith.constant 0 : index
    %c0_17 = arith.constant 0 : index
    %35 = vector.load %arg5[%c0_15, %c0_16, %c0_17] : memref<1x16x290xbf16, #tpu.memory_space<vmem>>, vector<1x16x256xbf16>
    %36 = vector.shape_cast %35 : vector<1x16x256xbf16> to vector<16x256xbf16>
    %37 = arith.select %18, %36, %21 : vector<16x256xi1>, vector<16x256xbf16>
    %c0_18 = arith.constant 0 : index
    %c0_19 = arith.constant 0 : index
    %38 = vector.load %arg6[%c0_18, %c0_19] : memref<144x256xbf16, #tpu.memory_space<vmem>>, vector<16x256xbf16>
    tpu.vector_store %arg6[%c0_18, %c0_19], %37 {strides = array<i32>} : memref<144x256xbf16, #tpu.memory_space<vmem>>, vector<16x256xbf16>,
    %c0_20 = arith.constant 0 : index
    %c0_21 = arith.constant 0 : index
    %c1 = arith.constant 1 : index
    %39 = vector.load %arg5[%c0_20, %c0_21, %c1] : memref<1x16x290xbf16, #tpu.memory_space<vmem>>, vector<1x16x256xbf16>
    %40 = vector.shape_cast %39 : vector<1x16x256xbf16> to vector<16x256xbf16>
    %c16 = arith.constant 16 : index
    %c0_22 = arith.constant 0 : index
    %41 = vector.load %arg6[%c16, %c0_22] : memref<144x256xbf16, #tpu.memory_space<vmem>>, vector<16x256xbf16>
    tpu.vector_store %arg6[%c16, %c0_22], %40 {strides = array<i32>} : memref<144x256xbf16, #tpu.memory_space<vmem>>, vector<16x256xbf16>,
    %c0_23 = arith.constant 0 : index
    %c0_24 = arith.constant 0 : index
    %c2 = arith.constant 2 : index
    %42 = vector.load %arg5[%c0_23, %c0_24, %c2] : memref<1x16x290xbf16, #tpu.memory_space<vmem>>, vector<1x16x256xbf16>
    %43 = vector.shape_cast %42 : vector<1x16x256xbf16> to vector<16x256xbf16>
    %44 = arith.select %20, %43, %21 : vector<16x256xi1>, vector<16x256xbf16>
    %c32 = arith.constant 32 : index
    %c0_25 = arith.constant 0 : index
    %45 = vector.load %arg6[%c32, %c0_25] : memref<144x256xbf16, #tpu.memory_space<vmem>>, vector<16x256xbf16>
    tpu.vector_store %arg6[%c32, %c0_25], %44 {strides = array<i32>} : memref<144x256xbf16, #tpu.memory_space<vmem>>, vector<16x256xbf16>,
    %c0_26 = arith.constant 0 : index
    %c0_27 = arith.constant 0 : index
    %c16_28 = arith.constant 16 : index
    %46 = vector.load %arg5[%c0_26, %c0_27, %c16_28] : memref<1x16x290xbf16, #tpu.memory_space<vmem>>, vector<1x16x256xbf16>
    %47 = vector.shape_cast %46 : vector<1x16x256xbf16> to vector<16x256xbf16>
    %48 = arith.select %18, %47, %21 : vector<16x256xi1>, vector<16x256xbf16>
    %c48 = arith.constant 48 : index
    %c0_29 = arith.constant 0 : index
    %49 = vector.load %arg6[%c48, %c0_29] : memref<144x256xbf16, #tpu.memory_space<vmem>>, vector<16x256xbf16>
    tpu.vector_store %arg6[%c48, %c0_29], %48 {strides = array<i32>} : memref<144x256xbf16, #tpu.memory_space<vmem>>, vector<16x256xbf16>,
    %c0_30 = arith.constant 0 : index
    %c0_31 = arith.constant 0 : index
    %c17_32 = arith.constant 17 : index
    %50 = vector.load %arg5[%c0_30, %c0_31, %c17_32] : memref<1x16x290xbf16, #tpu.memory_space<vmem>>, vector<1x16x256xbf16>
    %51 = vector.shape_cast %50 : vector<1x16x256xbf16> to vector<16x256xbf16>
    %c64 = arith.constant 64 : index
    %c0_33 = arith.constant 0 : index
    %52 = vector.load %arg6[%c64, %c0_33] : memref<144x256xbf16, #tpu.memory_space<vmem>>, vector<16x256xbf16>
    tpu.vector_store %arg6[%c64, %c0_33], %51 {strides = array<i32>} : memref<144x256xbf16, #tpu.memory_space<vmem>>, vector<16x256xbf16>,
    %c0_34 = arith.constant 0 : index
    %c0_35 = arith.constant 0 : index
    %c18 = arith.constant 18 : index
    %53 = vector.load %arg5[%c0_34, %c0_35, %c18] : memref<1x16x290xbf16, #tpu.memory_space<vmem>>, vector<1x16x256xbf16>
    %54 = vector.shape_cast %53 : vector<1x16x256xbf16> to vector<16x256xbf16>
    %55 = arith.select %20, %54, %21 : vector<16x256xi1>, vector<16x256xbf16>
    %c80 = arith.constant 80 : index
    %c0_36 = arith.constant 0 : index
    %56 = vector.load %arg6[%c80, %c0_36] : memref<144x256xbf16, #tpu.memory_space<vmem>>, vector<16x256xbf16>
    tpu.vector_store %arg6[%c80, %c0_36], %55 {strides = array<i32>} : memref<144x256xbf16, #tpu.memory_space<vmem>>, vector<16x256xbf16>,
    %c0_37 = arith.constant 0 : index
    %c0_38 = arith.constant 0 : index
    %c32_39 = arith.constant 32 : index
    %57 = vector.load %arg5[%c0_37, %c0_38, %c32_39] : memref<1x16x290xbf16, #tpu.memory_space<vmem>>, vector<1x16x256xbf16>
    %58 = vector.shape_cast %57 : vector<1x16x256xbf16> to vector<16x256xbf16>
    %59 = arith.select %18, %58, %21 : vector<16x256xi1>, vector<16x256xbf16>
    %c96 = arith.constant 96 : index
    %c0_40 = arith.constant 0 : index
    %60 = vector.load %arg6[%c96, %c0_40] : memref<144x256xbf16, #tpu.memory_space<vmem>>, vector<16x256xbf16>
    tpu.vector_store %arg6[%c96, %c0_40], %59 {strides = array<i32>} : memref<144x256xbf16, #tpu.memory_space<vmem>>, vector<16x256xbf16>,
    %c0_41 = arith.constant 0 : index
    %c0_42 = arith.constant 0 : index
    %c33 = arith.constant 33 : index
    %61 = vector.load %arg5[%c0_41, %c0_42, %c33] : memref<1x16x290xbf16, #tpu.memory_space<vmem>>, vector<1x16x256xbf16>
    %62 = vector.shape_cast %61 : vector<1x16x256xbf16> to vector<16x256xbf16>
    %c112 = arith.constant 112 : index
    %c0_43 = arith.constant 0 : index
    %63 = vector.load %arg6[%c112, %c0_43] : memref<144x256xbf16, #tpu.memory_space<vmem>>, vector<16x256xbf16>
    tpu.vector_store %arg6[%c112, %c0_43], %62 {strides = array<i32>} : memref<144x256xbf16, #tpu.memory_space<vmem>>, vector<16x256xbf16>,
    %c0_44 = arith.constant 0 : index
    %c0_45 = arith.constant 0 : index
    %c34 = arith.constant 34 : index
    %64 = vector.load %arg5[%c0_44, %c0_45, %c34] : memref<1x16x290xbf16, #tpu.memory_space<vmem>>, vector<1x16x256xbf16>
    %65 = vector.shape_cast %64 : vector<1x16x256xbf16> to vector<16x256xbf16>
    %66 = arith.select %20, %65, %21 : vector<16x256xi1>, vector<16x256xbf16>
    %c128 = arith.constant 128 : index
    %c0_46 = arith.constant 0 : index
    %67 = vector.load %arg6[%c128, %c0_46] : memref<144x256xbf16, #tpu.memory_space<vmem>>, vector<16x256xbf16>
    tpu.vector_store %arg6[%c128, %c0_46], %66 {strides = array<i32>} : memref<144x256xbf16, #tpu.memory_space<vmem>>, vector<16x256xbf16>,
    %c0_47 = arith.constant 0 : index
    %c0_48 = arith.constant 0 : index
    %68 = vector.load %arg2[%c0_47, %c0_48] : memref<16x144xbf16, #tpu.memory_space<vmem>>, vector<16x144xbf16>
    %c0_49 = arith.constant 0 : index
    %c0_50 = arith.constant 0 : index
    %69 = vector.load %arg6[%c0_49, %c0_50] : memref<144x256xbf16, #tpu.memory_space<vmem>>, vector<144x256xbf16>
    %cst_51 = arith.constant dense<0.000000e+00> : vector<16x256xf32>
    %70 = tpu.matmul %68, %69, %cst_51 {dimension_numbers = #tpu.dot_dimension_numbers<[1], [0], [0], [1], [0, 0, 1, 1], [], []>} : vector<16x144xbf16>, vector<144x256xbf16>, vector<16x256xf32> -> vector<16x256xf32>
    %c0_52 = arith.constant 0 : index
    %c0_53 = arith.constant 0 : index
    %71 = vector.load %arg3[%c0_52, %c0_53] : memref<16x1xf32, #tpu.memory_space<vmem>>, vector<16x1xf32>
    %72 = vector.broadcast %71 : vector<16x1xf32> to vector<16x256xf32>
    %73 = arith.addf %70, %72 : vector<16x256xf32>
    %c0_54 = arith.constant 0 : index
    %c0_55 = arith.constant 0 : index
    %c0_56 = arith.constant 0 : index
    %74 = vector.load %arg4[%c0_54, %c0_55, %c0_56] : memref<1x16x256xf32, #tpu.memory_space<vmem>>, vector<1x16x256xf32>
    %75 = vector.shape_cast %74 : vector<1x16x256xf32> to vector<16x256xf32>
    %76 = vector.shape_cast %73 : vector<16x256xf32> to vector<1x16x256xf32>
    tpu.vector_store %arg4[%c0_54, %c0_55, %c0_56], %76 {strides = array<i32>} : memref<1x16x256xf32, #tpu.memory_space<vmem>>, vector<1x16x256xf32>,
    return
  }
  func.func @transform_0(%arg0: i32) -> (i32, i32, i32) {
    %c0_i32 = arith.constant 0 : i32
    %c0_i32_0 = arith.constant 0 : i32
    %c0_i32_1 = arith.constant 0 : i32
    return %arg0, %c0_i32, %c0_i32_0 : i32, i32, i32
  }
  func.func @transform_1(%arg0: i32) -> (i32, i32) {
    %c0_i32 = arith.constant 0 : i32
    %c0_i32_0 = arith.constant 0 : i32
    %c0_i32_1 = arith.constant 0 : i32
    return %c0_i32, %c0_i32_0 : i32, i32
  }
  func.func @transform_2(%arg0: i32) -> (i32, i32) {
    %c0_i32 = arith.constant 0 : i32
    %c0_i32_0 = arith.constant 0 : i32
    %c0_i32_1 = arith.constant 0 : i32
    return %c0_i32, %c0_i32_0 : i32, i32
  }
  func.func @transform_3(%arg0: i32) -> (i32, i32, i32) {
    %c0_i32 = arith.constant 0 : i32
    %c0_i32_0 = arith.constant 0 : i32
    %c0_i32_1 = arith.constant 0 : i32
    return %arg0, %c0_i32, %c0_i32_0 : i32, i32, i32
  }
}

</mosaic_0001>

<bundles_post_ra>
// kernel: tpu_custom_call.1
= control target key start
LH: loop header
LB: loop body
LE: loop exit
PB: predicated region body
PF: predicated region fallthrough
CT: control target
= control target key end

     0   :  { %8 = vsyncpa [#allocation5], 0  ;;  %s1119_s0 = inlined_call_operand.hbm [shape: bf16[2,16,256], index: 0, kind: input, shape index: {}]   ;;  %s1120_s1 = inlined_call_operand.vmem [shape: bf16[16,144], index: 1, kind: input, shape index: {}]   ;;  %s1121_s2 = inlined_call_operand.vmem [shape: f32[16,1], index: 2, kind: input, shape index: {}]   ;;  %s1122_s3 = inlined_call_operand.hbm [shape: f32[2,16,256], index: 3, kind: output, shape index: {}]  }
   0x1   :  { %10 = vsyncpa [#allocation5 + $0x1], 0 }
   0x2   :  { %11 = vsyncpa [#allocation6], 0 }
   0x3   :  { %13 = vsyncpa [#allocation6 + $0x1], 0  ;;  %s901_s12 = smov 0   ;;  %s903_s13 = smov 0  }
   0x4   :  { %s905_s14 = smov 0   ;;  %s907_s15 = smov 0  }
   0x5 LB: > { %s922_s16 = sadd.s32 4294967295, %s859_s15   ;;  %s669_s17 = sadd.s32 4294967294, %s859_s15   ;;  %s859_s15 = sphi %s907_s15, %s1135_s15   ;;  %s855_s14 = sphi %s905_s14, %s1134_s14   ;;  %s851_s13 = sphi %s903_s13, %s1133_s13   ;;  %s847_s12 = sphi %s901_s12, %s1132_s12  }
   0x6   : > { %s926_s18 = sadd.s32 1, %s859_s15   ;;  %s26_s19 = sadd.s32 1, %s855_s14 }
   0x7   : > { %s23_s20 = ssub.s32 %s859_s15, %s926_s18  ;;  %p33_p0 = scmp.ne.s32.totalorder %s855_s14, %s851_s13 }
   0x8   : > { %p24_p1 = scmp.eq.s32.totalorder %s23_s20, 0  ;;  %p34_p2 = scmp.eq.s32.totalorder %s859_s15, 0 }
   0x9   : > { %p39_p3 = scmp.ne.s32.totalorder %s851_s13, %s847_s12  ;;  %p40_p4 = scmp.eq.s32.totalorder %s922_s16, 0 }
   0xa   : > { %s938_s21 = scalar_select %p24_p1, %s855_s14, %s26_s19  }
   0xb   : > { %p940_p5 = por %p34_p2, %p33_p0  ;;  %p944_p6 = por %p40_p4, %p39_p3 }
   0xc   : > { %p105_p7 = scmp.eq.s32.totalorder %s922_s16, 1  ;;  %p111_p8 = scmp.eq.s32.totalorder %s669_s17, 1 }
   0xd   : > { %p703_p10 = scmp.lt.s32.totalorder %s859_s15, 2  ;;  %s137_s26 = sand.u32 1, %s855_s14  }
   0xe   : > { %p951_p11 = por %p105_p7, %p33_p0  ;;  %p955_p12 = por %p111_p8, %p39_p3 }
   0xf   : > { %s688_s27 = sshll.u32 %s859_s15, 8  ;;  %s672_s28 = sshll.u32 %s137_s26, 4 }
  0x10   : > { %s1126_s24 = scalar_select %p951_p11, 1, 0 }
  0x11   : > { %s1127_s25 = scalar_select %p955_p12, 1, 0 }
  0x12   : > { %s964_s4 = scalar_lea.hbm %s1119_s0, %s688_s27  ;;  %s141_s5 = scalar_lea.vmem [#allocation4], %s672_s28 }
  0x13   : > { %s148_s6 = sshll.u32 %s141_s5, 4  ;;  %p968_p13 = pnand %p703_p10, %p940_p5  ;;  %s972_s6 = int_to_ptr.vmem [resolvable:$true] %s148_s6 }
  0x14   : > { %s974_s8 = scalar_lea.sflag [#allocation5], %s137_s26  ;;  %s763_s9 = scalar_lea.hbm %s964_s4, 256 }
  0x15   : > { %p764_p0 = scmp.ne.s32.totalorder %s964_s4, %s763_s9  ;;  %p765_p1 = pneg %p968_p13 }
  0x16   : > { %s768_s17 = scalar_lea.hbm %s1119_s0, 512  ;;  %p769_p4 = scmp.lt.u32.totalorder %s964_s4, %s1119_s0 }
  0x17   : > { %p766_p2 = pnand %p765_p1, %p764_p0  ;;  %p770_p5 = scmp.lt.u32.totalorder %s768_s17, %s763_s9 }
  0x18   : > { %p772_p8 = scmp.lt.u32.totalorder %s763_s9, %s964_s4 }
  0x19   : > { %p767_p3 = pneg %p766_p2  ;;  %p771_p7 = por %p770_p5, %p769_p4 }
  0x1b   : > { %p773_p10 = por %p772_p8, %p771_p7 }
  0x1d   : > { %p774_p9 = pnand %p773_p10, %p767_p3 }
  0x1f   : > { %777 = shalt.err (!%p774_p9)
}
  0x20   : > { %s778_s22 = scalar_lea.vmem %s972_s6, 256  ;;  %s861_s26 = smov [#allocation4]  }
  0x21   : > { %p779_p0 = scmp.ne.s32.totalorder %s972_s6, %s778_s22  ;;  %s783_s27 = sshll.u32 %s861_s26, 4  ;;  %s784_s27 = int_to_ptr.vmem [resolvable:$false] %s783_s27 }
  0x22   : > { %s785_s28 = scalar_lea.vmem %s784_s27, 512  ;;  %p786_p11 = scmp.lt.s32.totalorder %s972_s6, %s784_s27 }
  0x23   : > { %p781_p2 = pnand %p779_p0, %p765_p1  ;;  %p787_p4 = scmp.lt.s32.totalorder %s785_s28, %s778_s22 }
  0x25   : > { %p782_p12 = pneg %p781_p2  ;;  %p788_p5 = por %p787_p4, %p786_p11 }
  0x27   : > { %p789_p7 = pnand %p788_p5, %p782_p12 }
  0x29   : > { %792 = shalt.err (!%p789_p7)
}
  0x2a   : > { %s862_s29 = smov 128   ;;  %s863_s30 = smov 8  }
  0x2b   : > { %698 = dma.hbm_to_vmem [thread:$0]  (!%p968_p13), %s964_s4, 256, %s972_s6, %s974_s8, %s862_s29, %s862_s29, %s863_s30  }
  0x2c   : > { %p675_p9 = scmp.ge.s32.totalorder %s859_s15, 1  ;;  %p156_p1 = scmp.lt.s32.totalorder %s859_s15, 3 }
  0x2e   : > { %p157_p3 = pnand %p675_p9, %p156_p1 }
  0x2f   : > { %s1005_s5 = sand.u32 (!%p157_p3), 1, %s851_s13  }
  0x30   : > { %160 = sbr.rel (%p157_p3) target bundleno = 581 (0x245), region = 32  ;;  %s676_s9 = sshll.u32 (!%p157_p3), %s1005_s5, 4 }
  0x31   : > { %s163_s10 = scalar_lea.sflag (!%p157_p3), [#allocation5], %s1005_s5  ;;  %s166_s11 = scalar_lea.vmem (!%p157_p3), [#allocation4], %s676_s9 }
  0x37   : > { %838 = dma.done.wait (%p944_p6), %s163_s10, 256  }
  0x38   : > { %840 = vsyncadd (%p944_p6), %s163_s10, 4294967040  ;;  %v192_v0 = vlaneseq  ;;  %vm223_vm0 = vcmask 138240   ;;  %v864_v1 = vmov 0   ;;  %vm225_vm1 = vcmask 277640   ;;  %v757_v7 = vld [vmem:[%s166_s11] ss:$8 sps:$4 sm:$0xff]  }
  0x39   : > { %224 = vst.msk [vmem:[#allocation2] sm:$0xff] %vm223_vm0, %v864_v1  ;;  %755 = vset.pattern.permute.xlu0 %v864_v1  ;;  %756 = vset.pattern.permute.xlu1 %v864_v1  ;;  %v759_v9 = vld [vmem:[%s166_s11 + $0x4] ss:$8 sps:$4 sm:$0xff]   ;;  %s865_s23 = smov 17   ;;  %s866_s4 = smov 2   ;;  %vm246_vm8 = vcmask 1047688  }
  0x3a   : > { %v193_v2 = vand.u32 127, %v192_v0  ;;  %226 = vst.msk [vmem:[#allocation2 + $0x10] sm:$0xff] %vm225_vm1, %v864_v1  ;;  %v255_v3 = vshrl.u32 %v192_v0, 7  ;;  %237 = vrot.lane.b32.xlu0 %v757_v7, %s865_s23  ;;  %s867_s6 = smov 16   ;;  %s868_s7 = smov 18   ;;  %vm304_vm14 = vcmask 15360  }
  0x3b   : > { %s869_s8 = smov 32   ;;  %s870_s17 = smov 34   ;;  %v762_v49 = vld [vmem:[%s1120_s1 + $0x4] ss:$8 sps:$4 sm:$0xff]  }
  0x3c   : > { %v194_v4 = vadd.s32 128, %v193_v2  ;;  %v199_v5 = vand.u32 15, %v193_v2  ;;  %v256_v8 = vsub.s32 0, %v255_v3  ;;  %v260_v10 = vsub.s32 4, %v255_v3  ;;  %s871_s19 = smov 127   ;;  %s872_s20 = smov 111  }
  0x3d   : > { %s873_s22 = smov 126   ;;  %s874_s26 = smov 112   ;;  %v510_v53 = vld [vmem:[%s1121_s2] sm:$0xff]  ;;  %v511_v55 = vld [vmem:[%s1121_s2 + $0x8] sm:$0xff] }
  0x3e   : > { %v206_v6 = vand.u32 15, %v194_v4  ;;  %vm221_vm2 = vcmp.ne.s32.totalorder %v199_v5, 15  ;;  %vm219_vm3 = vcmp.ne.s32.totalorder %v199_v5, 0  ;;  %239 = vrot.lane.b32.xlu0 %v759_v9, %s865_s23  ;;  %s875_s27 = smov 110   ;;  %s876_s28 = smov 96  }
  0x3f   : > { %s877_s29 = smov 95   ;;  %s878_s10 = smov 94  }
  0x40   : > { %vm222_vm4 = vcmp.ne.s32.totalorder %v206_v6, 15  ;;  %vm220_vm5 = vcmp.ne.s32.totalorder %v206_v6, 0  ;;  %p1129_p11 = scmp.ne.s32.totalorder %s1126_s24, 0  ;;  %s879_s9 = smov [#allocation7]  }
  0x41   : > { %vm290_vm6 = vmpackc.low %vm222_vm4, %vm221_vm2  ;;  %vm385_vm4 = vcmask 146432  }
  0x42   : > { %v291_v11 = vsel %vm290_vm6, 65537, %v864_v1  ;;  %vm252_vm7 = vmpackc.low %vm220_vm5, %vm219_vm3 }
  0x43   : > { %v295_v12 = vrot.slane %v291_v11, %v256_v8  ;;  %v253_v13 = vsel %vm252_vm7, 65537, %v864_v1  ;;  %v299_v14 = vrot.slane %v291_v11, %v260_v10  ;;  %vm416_vm7 = vcmask 261120  }
  0x44   : > { %v257_v15 = vrot.slane %v253_v13, %v256_v8  ;;  %v261_v16 = vrot.slane %v253_v13, %v260_v10 }
  0x45   : > { %300 = vrot.lane.b32.xlu1 %v295_v12, %s866_s4 }
  0x46   : > { %331 = vrot.lane.b32.xlu0 %v257_v15, %s867_s6  ;;  %vm263_vm9 = vcmp.ne.s16.totalorder %v261_v16, 0  ;;  %vm262_vm10 = vcmp.ne.s16.totalorder %v257_v15, 0 }
  0x49   : > { %302 = vrot.lane.b32.xlu1 %v299_v14, %s866_s4 }
  0x4a   : > { %381 = vrot.lane.b32.xlu0 %v295_v12, %s868_s7 }
  0x4d   : > { %333 = vrot.lane.b32.xlu1 %v261_v16, %s867_s6 }
  0x4e   : > { %412 = vrot.lane.b32.xlu0 %v257_v15, %s869_s8 }
  0x51   : > { %383 = vrot.lane.b32.xlu1 %v299_v14, %s868_s7 }
  0x52   : > { %462 = vrot.lane.b32.xlu0 %v295_v12, %s870_s17 }
  0x55   : > { %414 = vrot.lane.b32.xlu1 %v261_v16, %s869_s8 }
  0x59   : > { %464 = vrot.lane.b32.xlu1 %v299_v14, %s870_s17 }
  0xac   : > { %v238_v17 = vpop.permute.xlu0 %237 }
  0xad   : > { %247 = vst.msk [vmem:[#allocation2] sm:$0xff] %vm246_vm8, %v238_v17 }
  0xb0   : > { %v240_v19 = vpop.permute.xlu0 %239 }
  0xb1   : > { %v1017_v20 = vsel %vm223_vm0, %v238_v17, %v240_v19  ;;  %249 = vst.msk [vmem:[#allocation2 + $0x10] sm:$0xff] %vm223_vm0, %v240_v19  ;;  %vm335_vm0 = vcmask 130048  }
  0xb2   : > { %690 = vmatprep.subr.msk.bf16.mxu0 %vm263_vm9, %v1017_v20  ;;  %682 = vmatprep.mubr.msk.bf16.mxu0 %vm335_vm0, %v762_v49 }
  0xb4   : > { %v1021_v22 = vld [vmem:[#allocation2] sm:$0xff] }
  0xb5   : > { %274 = vrot.lane.b32.xlu0 %v1021_v22, %s871_s19  ;;  %v264_v23 = vsel %vm262_vm10, %v1021_v22, 0 }
  0xb6   : > { %536 = vmatpush1.bf16.msra.mxu0 %v264_v23 }
  0xb7   : > { %v301_v18 = vpop.permute.xlu1 %300 }
  0xb8   : > { %v1025_v24 = vld [vmem:[#allocation2 + $0x10] sm:$0xff]  ;;  %vm306_vm11 = vcmp.ne.s16.totalorder %v301_v18, 0  ;;  %v332_v26 = vpop.permute.xlu0 %331 }
  0xb9   : > { %278 = vrot.lane.b32.xlu1 %v1025_v24, %s871_s19  ;;  %369 = vrot.lane.b32.xlu0 %v1025_v24, %s872_s20  ;;  %v309_v27 = vsel %vm306_vm11, %v1021_v22, 0  ;;  %vm337_vm15 = vcmp.ne.s16.totalorder %v332_v26, 0  ;;  %vm466_vm11 = vcmask 277504  }
  0xba   : > { %v340_v33 = vsel %vm337_vm15, %v1021_v22, 0  ;;  %vm280_vm15 = vcmask 1039360  }
  0xbb   : > { %v303_v21 = vpop.permute.xlu1 %302 }
  0xbc   : > { %vm308_vm12 = vcmp.ne.s16.totalorder %v303_v21, 0  ;;  %v305_v30 = vsel %vm304_vm14, %v301_v18, %v303_v21  ;;  %v382_v31 = vpop.permute.xlu0 %381 }
  0xbd   : > { %315 = vrot.lane.b32.xlu1 %v309_v27, %s873_s22  ;;  %276 = vrot.lane.b32.xlu0 %v1017_v20, %s871_s19  ;;  %v311_v29 = vsel %vm308_vm12, %v1025_v24, 0  ;;  %vm307_vm1 = vcmp.ne.s16.totalorder %v305_v30, 0  ;;  %vm387_vm2 = vcmp.ne.s16.totalorder %v382_v31, 0  ;;  %s677_s19 = sshll.u32 %s1005_s5, 5 }
  0xbe   : > { %v310_v35 = vsel %vm307_vm1, %v1017_v20, 0  ;;  %v390_v36 = vsel %vm387_vm2, %v1021_v22, 0  ;;  %vm352_vm1 = vcmask 916480   ;;  %vm371_vm2 = vcmask 908288  }
  0xbf   : > { %v334_v25 = vpop.permute.xlu1 %333 }
  0xc0   : > { %vm339_vm13 = vcmp.ne.s16.totalorder %v334_v25, 0  ;;  %v336_v34 = vsel %vm335_vm0, %v332_v26, %v334_v25  ;;  %v413_v40 = vpop.permute.xlu0 %412  ;;  %vm321_vm0 = vcmask 1031168  }
  0xc1   : > { %v342_v28 = vsel %vm339_vm13, %v1025_v24, 0  ;;  %319 = vrot.lane.b32.xlu0 %v311_v29, %s873_s22  ;;  %vm338_vm3 = vcmp.ne.s16.totalorder %v336_v34, 0  ;;  %vm418_vm9 = vcmp.ne.s16.totalorder %v413_v40, 0 }
  0xc2   : > { %350 = vrot.lane.b32.xlu1 %v342_v28, %s874_s26  ;;  %v341_v38 = vsel %vm338_vm3, %v1017_v20, 0  ;;  %v421_v44 = vsel %vm418_vm9, %v1021_v22, 0  ;;  %vm402_vm3 = vcmask 900096  }
  0xc3   : > { %v384_v32 = vpop.permute.xlu1 %383 }
  0xc4   : > { %vm389_vm5 = vcmp.ne.s16.totalorder %v384_v32, 0  ;;  %v386_v39 = vsel %vm385_vm4, %v382_v31, %v384_v32  ;;  %v463_v48 = vpop.permute.xlu0 %462  ;;  %vm433_vm4 = vcmask 785408   ;;  %v760_v32 = vld [vmem:[%s1120_s1] ss:$8 sps:$4 sm:$0xff]  }
  0xc5   : > { %346 = vrot.lane.b32.xlu0 %v340_v33, %s874_s26  ;;  %v392_v41 = vsel %vm389_vm5, %v1025_v24, 0  ;;  %vm388_vm8 = vcmp.ne.s16.totalorder %v386_v39, 0  ;;  %vm468_vm14 = vcmp.ne.s16.totalorder %v463_v48, 0  ;;  %vm452_vm5 = vcmask 777216  }
  0xc6   : > { %367 = vrot.lane.b32.xlu1 %v1017_v20, %s872_s20  ;;  %v391_v45 = vsel %vm388_vm8, %v1017_v20, 0  ;;  %v471_v54 = vsel %vm468_vm14, %v1021_v22, 0 }
  0xc7   : > { %v415_v37 = vpop.permute.xlu1 %414 }
  0xc8   : > { %vm420_vm6 = vcmp.ne.s16.totalorder %v415_v37, 0  ;;  %v417_v43 = vsel %vm416_vm7, %v413_v40, %v415_v37 }
  0xc9   : > { %396 = vrot.lane.b32.xlu0 %v390_v36, %s875_s27  ;;  %v423_v42 = vsel %vm420_vm6, %v1025_v24, 0  ;;  %vm419_vm10 = vcmp.ne.s16.totalorder %v417_v43, 0  ;;  %vm483_vm6 = vcmask 769024  }
  0xca   : > { %317 = vrot.lane.b32.xlu1 %v310_v35, %s873_s22  ;;  %v422_v47 = vsel %vm419_vm10, %v1017_v20, 0 }
  0xcb   : > { %v465_v46 = vpop.permute.xlu1 %464 }
  0xcc   : > { %v467_v50 = vsel %vm466_vm11, %v463_v48, %v465_v46  ;;  %vm470_vm13 = vcmp.ne.s16.totalorder %v465_v46, 0 }
  0xcd   : > { %348 = vrot.lane.b32.xlu0 %v341_v38, %s874_s26  ;;  %vm469_vm12 = vcmp.ne.s16.totalorder %v467_v50, 0  ;;  %v473_v52 = vsel %vm470_vm13, %v1025_v24, 0  ;;  %s689_s26 = sshll.u32 %s922_s16, 9  ;;  %s583_s16 = scalar_lea.sflag [#allocation6], %s1005_s5 }
  0xce   : > { %365 = vrot.lane.b32.xlu1 %v1021_v22, %s872_s20  ;;  %v472_v51 = vsel %vm469_vm12, %v1017_v20, 0  ;;  %s188_s20 = scalar_lea.vmem [#allocation7], %s677_s19 }
  0xcf   : > { %s596_s22 = sshll.u32 %s188_s20, 4  ;;  %s1069_s22 = int_to_ptr.vmem [resolvable:$true] %s596_s22 }
  0xd0   : > { %s793_s30 = scalar_lea.vmem %s1069_s22, 512 }
  0xd1   : > { %431 = vrot.lane.b32.xlu0 %v423_v42, %s876_s28  ;;  %p794_p6 = scmp.ne.s32.totalorder %s1069_s22, %s793_s30 }
  0xd2   : > { %400 = vrot.lane.b32.xlu1 %v392_v41, %s875_s27 }
  0xd3   : > { %p795_p12 = pnand %p794_p6, %p1129_p11 }
  0xd5   : > { %398 = vrot.lane.b32.xlu0 %v391_v45, %s875_s27  ;;  %p796_p13 = pneg %p795_p12 }
  0xd6   : > { %427 = vrot.lane.b32.xlu1 %v421_v44, %s876_s28 }
  0xd9   : > { %448 = vrot.lane.b32.xlu0 %v1017_v20, %s877_s29 }
  0xda   : > { %429 = vrot.lane.b32.xlu1 %v422_v47, %s876_s28 }
  0xdd   : > { %446 = vrot.lane.b32.xlu0 %v1021_v22, %s877_s29 }
  0xde   : > { %450 = vrot.lane.b32.xlu1 %v1025_v24, %s877_s29  ;;  %s1074_s29 = scalar_lea.hbm %s1122_s3, %s689_s26 }
  0xe1   : > { %481 = vrot.lane.b32.xlu0 %v473_v52, %s878_s10 }
  0xe2   : > { %479 = vrot.lane.b32.xlu1 %v472_v51, %s878_s10 }
  0xe5   : > { %514 = vperm.xlu0 %755, %v510_v53  }
  0xe6   : > { %477 = vrot.lane.b32.xlu1 %v471_v54, %s878_s10  ;;  %s797_s10 = sshll.u32 %s879_s9, 4  ;;  %s798_s10 = int_to_ptr.vmem [resolvable:$false] %s797_s10 }
  0xe7   : > { %s799_s11 = scalar_lea.vmem %s798_s10, 1024  ;;  %p800_p8 = scmp.lt.s32.totalorder %s1069_s22, %s798_s10 }
  0xe8   : > { %p801_p10 = scmp.lt.s32.totalorder %s799_s11, %s793_s30 }
  0xea   : > { %519 = vperm.xlu1 %756, %v511_v55   ;;  %p802_p0 = por %p801_p10, %p800_p8 }
  0xec   : > { %p803_p2 = pnand %p802_p0, %p796_p13 }
 0x127   : > { %v275_v56 = vpop.permute.xlu0 %274 }
 0x12b   : > { %v279_v57 = vpop.permute.xlu1 %278  ;;  %v370_v58 = vpop.permute.xlu0 %369 }
 0x12f   : > { %v316_v59 = vpop.permute.xlu1 %315  ;;  %v277_v60 = vpop.permute.xlu0 %276 }
 0x130   : > { %v282_v61 = vsel %vm280_vm15, %v277_v60, %v279_v57  ;;  %v281_v62 = vsel %vm280_vm15, %v275_v56, %v277_v60 }
 0x131   : > { %537 = vmatprep.subr.bf16.mxu0 %v282_v61 }
 0x132   : > { %538 = vmatpush1.bf16.msra.mxu0 %v281_v62 }
 0x133   : > { %v320_v0 = vpop.permute.xlu0 %319 }
 0x134   : > { %v351_v63 = vpop.permute.xlu1 %350 }
 0x137   : > { %v347_v2 = vpop.permute.xlu0 %346 }
 0x138   : > { %v368_v1 = vpop.permute.xlu1 %367 }
 0x139   : > { %v373_v11 = vsel %vm371_vm2, %v368_v1, %v370_v58 }
 0x13b   : > { %v397_v4 = vpop.permute.xlu0 %396 }
 0x13c   : > { %v318_v3 = vpop.permute.xlu1 %317 }
 0x13d   : > { %v323_v5 = vsel %vm321_vm0, %v318_v3, %v320_v0  ;;  %v322_v6 = vsel %vm321_vm0, %v316_v59, %v318_v3 }
 0x13e   : > { %539 = vmatprep.subr.bf16.mxu0 %v323_v5 }
 0x13f   : > { %540 = vmatpush1.bf16.msra.mxu0 %v322_v6  ;;  %v349_v8 = vpop.permute.xlu0 %348 }
 0x140   : > { %v366_v7 = vpop.permute.xlu1 %365  ;;  %v354_v9 = vsel %vm352_vm1, %v349_v8, %v351_v63  ;;  %v353_v10 = vsel %vm352_vm1, %v347_v2, %v349_v8 }
 0x141   : > { %541 = vmatprep.subr.bf16.mxu0 %v354_v9  ;;  %v372_v14 = vsel %vm371_vm2, %v366_v7, %v368_v1 }
 0x143   : > { %542 = vmatpush1.bf16.msra.mxu0 %v353_v10  ;;  %v432_v13 = vpop.permute.xlu0 %431 }
 0x144   : > { %v401_v12 = vpop.permute.xlu1 %400  ;;  %543 = vmatprep.subr.bf16.mxu0 %v373_v11 }
 0x147   : > { %544 = vmatpush1.bf16.msra.mxu0 %v372_v14  ;;  %v399_v16 = vpop.permute.xlu0 %398 }
 0x148   : > { %v428_v15 = vpop.permute.xlu1 %427  ;;  %v404_v17 = vsel %vm402_vm3, %v399_v16, %v401_v12  ;;  %v403_v18 = vsel %vm402_vm3, %v397_v4, %v399_v16 }
 0x149   : > { %545 = vmatprep.subr.bf16.mxu0 %v404_v17 }
 0x14b   : > { %546 = vmatpush1.bf16.msra.mxu0 %v403_v18  ;;  %v449_v20 = vpop.permute.xlu0 %448 }
 0x14c   : > { %v430_v19 = vpop.permute.xlu1 %429 }
 0x14d   : > { %v435_v21 = vsel %vm433_vm4, %v430_v19, %v432_v13  ;;  %v434_v22 = vsel %vm433_vm4, %v428_v15, %v430_v19 }
 0x14e   : > { %547 = vmatprep.subr.bf16.mxu0 %v435_v21 }
 0x14f   : > { %548 = vmatpush1.bf16.msra.mxu0 %v434_v22  ;;  %v447_v24 = vpop.permute.xlu0 %446 }
 0x150   : > { %v451_v23 = vpop.permute.xlu1 %450  ;;  %v453_v26 = vsel %vm452_vm5, %v447_v24, %v449_v20 }
 0x151   : > { %v454_v25 = vsel %vm452_vm5, %v449_v20, %v451_v23 }
 0x152   : > { %549 = vmatprep.subr.bf16.mxu0 %v454_v25 }
 0x153   : > { %550 = vmatpush1.bf16.msra.mxu0 %v453_v26  ;;  %v482_v28 = vpop.permute.xlu0 %481 }
 0x154   : > { %v480_v27 = vpop.permute.xlu1 %479 }
 0x155   : > { %v485_v29 = vsel %vm483_vm6, %v480_v27, %v482_v28 }
 0x156   : > { %551 = vmatprep.subr.bf16.mxu0 %v485_v29 }
 0x158   : > { %v478_v30 = vpop.permute.xlu1 %477 }
 0x159   : > { %v484_v31 = vsel %vm483_vm6, %v478_v30, %v480_v27 }
 0x15a   : > { %552 = vmatpush1.bf16.msra.mxu0 %v484_v31 }
 0x15d   : > { %568 = vmatmul.mubr.bf16.vlgmr.msra.gmra.mrb[0].mxu0 %v760_v32 }
 0x164   : > { %v515_v33 = vpop.permute.xlu0 %514 }
 0x169   : > { %v520_v35 = vpop.permute.xlu1 %519 }
 0x230   : > { %v569_v34 = vpop.f32.mrb[0].mxu0 }
 0x231   : > { %v570_v36 = vadd.f32 %v569_v34, %v515_v33  ;;  %v571_v37 = vpop.f32.mrb[1].mxu0 }
 0x232   : > { %v572_v38 = vadd.f32 %v571_v37, %v515_v33  ;;  %v573_v39 = vpop.f32.mrb[2].mxu0 }
 0x233   : > { %578 = vst [vmem:[%s188_s20] sm:$0xff] %v570_v36  ;;  %v574_v40 = vadd.f32 %v573_v39, %v520_v35  ;;  %v575_v41 = vpop.f32.mrb[3].mxu0 }
 0x234   : > { %579 = vst [vmem:[%s188_s20 + $0x8] sm:$0xff] %v572_v38  ;;  %v576_v42 = vadd.f32 %v575_v41, %v520_v35 }
 0x235   : > { %580 = vst [vmem:[%s188_s20 + $0x10] sm:$0xff] %v574_v40 }
 0x236   : > { %581 = vst [vmem:[%s188_s20 + $0x18] sm:$0xff] %v576_v42 }
 0x237   : > { %806 = shalt.err (!%p803_p2)
}
 0x238   : > { %s807_s23 = scalar_lea.hbm %s1074_s29, 512  ;;  %s811_s8 = scalar_lea.hbm %s1122_s3, 1024 }
 0x239   : > { %p808_p4 = scmp.ne.s32.totalorder %s1074_s29, %s807_s23  ;;  %p812_p9 = scmp.lt.u32.totalorder %s1074_s29, %s1122_s3 }
 0x23a   : > { %p813_p1 = scmp.lt.u32.totalorder %s811_s8, %s807_s23  ;;  %p815_p6 = scmp.lt.u32.totalorder %s807_s23, %s1074_s29 }
 0x23b   : > { %p809_p5 = pnand %p808_p4, %p1129_p11 }
 0x23c   : > { %p814_p3 = por %p813_p1, %p812_p9 }
 0x23d   : > { %p810_p7 = pneg %p809_p5 }
 0x23e   : > { %p816_p12 = por %p815_p6, %p814_p3 }
 0x240   : > { %p817_p13 = pnand %p816_p12, %p810_p7 }
 0x242   : > { %820 = shalt.err (!%p817_p13)
}
 0x243   : > { %s880_s20 = smov 256  }
 0x244   : > { %693 = dma.vmem_to_hbm [thread:$0]  (%p1129_p11), %s1069_s22, 512, %s1074_s29, %s583_s16, %s880_s20, %s880_s20, %s867_s6  }
 0x245 PF: > { %s611_s26 = sand.u32 1, %s847_s12   ;;  %p1130_p8 = scmp.ne.s32.totalorder %s1127_s25, 0 }
 0x246   : > { %p1131_p10 = scmp.ge.s32.totalorder %s859_s15, 2  ;;  %s612_s27 = scalar_lea.sflag [#allocation6], %s611_s26 }
 0x248   : > { %p700_p0 = pnand %p1131_p10, %p1130_p8 }
 0x24a   : > { %842 = dma.done.wait (!%p700_p0), %s612_s27, 512  }
 0x24b   : > { %844 = vsyncadd (!%p700_p0), %s612_s27, 4294966784  ;;  %p16_p2 = scmp.ge.s32.totalorder %s926_s18, 4   ;;  %s1132_s12 = smov %s851_s13 }
 0x24c   : > { %s1133_s13 = smov %s855_s14  ;;  %s1134_s14 = smov %s938_s21 }
 0x24d   : > { %s1135_s15 = smov %s926_s18  ;;  %18 = sbr.rel (!%p16_p2) target bundleno = 5 (0x5), region = 77 }
 0x254   :  { %617 = vsyncpa [#allocation5], 1 }
 0x255   :  { %619 = vsyncpa [#allocation5 + $0x1], 1 }
 0x256   :  { %620 = vsyncpa [#allocation6], 1 }
 0x257   :  { %622 = vsyncpa [#allocation6 + $0x1], 1 }

</bundles_post_ra>
